<compile_context>
chip_gen: v5e
topology: v5e:2x2
jax: 0.10.0
libtpu: 0.0.40
codegen_flags: <defaults>
</compile_context>

<pallas_src>
import functools

import jax
import jax.numpy as jnp
from jax.experimental import pallas as pl
from jax.experimental.pallas import tpu as pltpu


_MIB = 1024 * 1024
# Per-input-block byte targets (in the input dtype).
_ROWS_BLOCK_BYTES = 4 * _MIB      # C >= 128 rows kernel
_PACKED_BLOCK_BYTES = 3 * _MIB    # packed MXU kernel (f32 temps ~6x block)
_CFIRST_BLOCK_BYTES = 4 * _MIB    # channels_first kernel
_VMEM_MARGIN_BYTES = 4 * _MIB     # headroom for Mosaic internal scratch


def _round_up(x, m):
    return ((x + m - 1) // m) * m


def _pick_tile(total, target, align, min_steps=1):
    """Pick a tile along one axis.

    The tile is a multiple of `align` (or the full extent when total <= align),
    close to `target`, and -- when the extent allows -- yields at least `min_steps`
    grid steps so a 'parallel' axis can be sharded across both TensorCores on v7x.
    Non-divisible extents rely on Pallas partial-last-block handling (no padding).
    """
    if total <= align:
        return total
    tile = min(_round_up(total, align), max(align, _round_up(target, align)))
    while min_steps > 1 and pl.cdiv(total, tile) < min_steps and tile > align:
        tile = max(align, _round_up(tile // 2, align))
    return tile


def _compiler_params(dims, vmem_bytes):
    # Computed, per-call VMEM budget (floor 16 MiB); no blanket 48 MiB cap.
    return pltpu.CompilerParams(
        dimension_semantics=dims,
        vmem_limit_bytes=int(max(vmem_bytes, 16 * _MIB)),
    )


# --------------------------------------------------------------------------- kernels

def _split_hi_lo(x):
    """Split f32 x into bf16 hi/lo with x ~= hi + lo (error ~2^-17 relative)."""
    hi = x.astype(jnp.bfloat16)
    lo = (x - hi.astype(jnp.float32)).astype(jnp.bfloat16)
    return hi, lo


def _segment_sums(x, m):
    """Per-segment lane sums of f32 `x` via two native bf16 MXU passes.

    `m` is a {0,1} block-diagonal matrix stored in bf16 (exact), so dot(hi, m) and
    dot(lo, m) are exact segment sums of the hi/lo parts; their f32 sum recovers the
    f32 segment sums to ~2^-17 relative error.  No Precision.HIGHEST (~6 passes).
    """
    hi, lo = _split_hi_lo(x)
    return (jnp.dot(hi, m, preferred_element_type=jnp.float32)
            + jnp.dot(lo, m, preferred_element_type=jnp.float32))


def _ln_packed_kernel(x_ref, w_ref, b_ref, m_ref, o_ref, *, eps, c):
    """channels_last, lane-packed: x_ref is (TM, G*C); each row holds G tokens of C
    channels contiguously along the lane axis.  m_ref is a (G*C, G*C) block-diagonal
    {0,1} bf16 matrix so x @ m broadcasts each token's channel sum back over its C
    lanes -- everything stays lane-dense (no in-kernel reshape, no masked stores)."""
    x = x_ref[...].astype(jnp.float32)
    m = m_ref[...]
    inv_c = jnp.float32(1.0 / c)
    s1 = _segment_sums(x, m)
    s2 = _segment_sums(x * x, m)
    mean = s1 * inv_c
    # One-pass variance: fine for activation-like inputs; near-exact segment sums.
    var = jnp.maximum(s2 * inv_c - mean * mean, 0.0)
    inv = jax.lax.rsqrt(var + eps)
    o_ref[...] = ((x - mean) * inv * w_ref[...] + b_ref[...]).astype(o_ref.dtype)


def _ln_rows_kernel(x_ref, w_ref, b_ref, o_ref, *, eps, c):
    """channels_last, one token per row (C >= 128, or C not a divisor of 128).
    The lane reductions land on the XLU; on v5e/v6e they hide under HBM time.
    If a v7x bundle dump shows the XLU binding, fold pc/128 lane-blocks with VALU
    adds first (verify before changing)."""
    x = x_ref[...].astype(jnp.float32)
    inv_c = jnp.float32(1.0 / c)
    s1 = jnp.sum(x, axis=-1, keepdims=True)
    s2 = jnp.sum(x * x, axis=-1, keepdims=True)
    mean = s1 * inv_c
    var = jnp.maximum(s2 * inv_c - mean * mean, 0.0)
    inv = jax.lax.rsqrt(var + eps)
    o_ref[...] = ((x - mean) * inv * w_ref[...] + b_ref[...]).astype(o_ref.dtype)


def _ln_cfirst_kernel(x_ref, w_ref, b_ref, o_ref, *, eps, c):
    """channels_first: block is (1, C, TILE_HW); C on sublanes, HW on lanes.
    Reduction over C is a sublane reduce; no data transposes anywhere."""
    x = x_ref[...].astype(jnp.float32)               # (1, C, TL)
    inv_c = jnp.float32(1.0 / c)
    s1 = jnp.sum(x, axis=1, keepdims=True)           # (1, 1, TL)
    s2 = jnp.sum(x * x, axis=1, keepdims=True)
    mean = s1 * inv_c
    var = jnp.maximum(s2 * inv_c - mean * mean, 0.0)
    inv = jax.lax.rsqrt(var + eps)
    o_ref[...] = ((x - mean) * inv * w_ref[...] + b_ref[...]).astype(o_ref.dtype)


# --------------------------------------------------------------------------- wrappers

def _layernorm_channels_last(x2d, weight, bias, eps):
    """x2d: (rows, C); normalize every row over C."""
    rows, c = x2d.shape
    itemsize = jnp.dtype(x2d.dtype).itemsize
    w32 = weight.astype(jnp.float32).reshape(1, c)
    b32 = bias.astype(jnp.float32).reshape(1, c)

    g = 128 // c if (c < 128 and 128 % c == 0) else 1
    # TODO(synk): C < 128 that does not divide 128 (e.g. EdgeNeXt's C=88) still takes
    # the lane-sparse rows path below; a block-diagonal packing for such C needs a
    # (lcm(C,128))^2 matmul whose FLOP/byte exceeds the HBM roofline on every chip
    # generation, so it is intentionally not attempted.

    if g > 1:
        pc = g * c
        pad = (-rows) % g
        rows_eff = rows + pad
        if pad:
            # Only row counts not divisible by G pay this extra HBM pass; padding is
            # on the non-reduction axis only, so valid rows are unaffected.
            x2d = jnp.pad(x2d, ((0, pad), (0, 0)))
        packed_rows = rows_eff // g
        xp = x2d.reshape(packed_rows, pc)            # free row-major regroup
        tm_target = max(8, (_PACKED_BLOCK_BYTES // (pc * itemsize)) // 8 * 8)
        tm = _pick_tile(packed_rows, tm_target, 8, min_steps=2)
        grid = (pl.cdiv(packed_rows, tm),)

        wp = jnp.tile(w32, (1, g))                   # (1, pc)
        bp = jnp.tile(b32, (1, g))
        seg = jnp.arange(pc, dtype=jnp.int32) // c
        m = (seg[:, None] == seg[None, :]).astype(jnp.bfloat16)   # exact {0,1}

        blk_in = tm * pc * itemsize
        blk_f32 = tm * pc * 4
        vmem = (4 * blk_in + 6 * blk_f32            # dbuf in+out, f32 temporaries
                + 2 * pc * 4 + pc * pc * 2          # resident w/b and m
                + _VMEM_MARGIN_BYTES)
        yp = pl.pallas_call(
            functools.partial(_ln_packed_kernel, eps=eps, c=c),
            out_shape=jax.ShapeDtypeStruct((packed_rows, pc), x2d.dtype),
            grid_spec=pltpu.PrefetchScalarGridSpec(
                num_scalar_prefetch=0,
                grid=grid,
                in_specs=[
                    pl.BlockSpec((tm, pc), lambda i: (i, 0)),
                    pl.BlockSpec((1, pc), lambda i: (0, 0)),
                    pl.BlockSpec((1, pc), lambda i: (0, 0)),
                    pl.BlockSpec((pc, pc), lambda i: (0, 0)),
                ],
                out_specs=pl.BlockSpec((tm, pc), lambda i: (i, 0)),
            ),
            compiler_params=_compiler_params(("parallel",), vmem),
        )(xp, wp, bp, m)
        y = yp.reshape(rows_eff, c)
        return y[:rows] if pad else y

    # g == 1: token-per-row kernel.  No padding / slicing anywhere (cdiv grid).
    tm_target = max(8, (_ROWS_BLOCK_BYTES // (c * itemsize)) // 8 * 8)
    tm = _pick_tile(rows, tm_target, 8, min_steps=2)
    grid = (pl.cdiv(rows, tm),)
    blk_in = tm * c * itemsize
    blk_f32 = tm * c * 4
    vmem = 4 * blk_in + 4 * blk_f32 + 2 * c * 4 + _VMEM_MARGIN_BYTES
    return pl.pallas_call(
        functools.partial(_ln_rows_kernel, eps=eps, c=c),
        out_shape=jax.ShapeDtypeStruct((rows, c), x2d.dtype),
        grid_spec=pltpu.PrefetchScalarGridSpec(
            num_scalar_prefetch=0,
            grid=grid,
            in_specs=[
                pl.BlockSpec((tm, c), lambda i: (i, 0)),
                pl.BlockSpec((1, c), lambda i: (0, 0)),
                pl.BlockSpec((1, c), lambda i: (0, 0)),
            ],
            out_specs=pl.BlockSpec((tm, c), lambda i: (i, 0)),
        ),
        compiler_params=_compiler_params(("parallel",), vmem),
    )(x2d, w32, b32)


def _layernorm_channels_first(x, weight, bias, eps):
    """x: (N, C, H, W); normalize over C.  No transposes, no padding, no slicing."""
    n, c, h, w = x.shape
    hw = h * w
    itemsize = jnp.dtype(x.dtype).itemsize
    x3 = x.reshape(n, c, hw)                          # free reshape
    tl_target = max(128, (_CFIRST_BLOCK_BYTES // (c * itemsize)) // 128 * 128)
    # v7x megacore: if the batch axis alone can't give 2 parallel steps, ask the HW
    # axis for >=2.
    tl = _pick_tile(hw, tl_target, 128, min_steps=(2 if n == 1 else 1))
    grid = (n, pl.cdiv(hw, tl))
    w3 = weight.astype(jnp.float32).reshape(1, c, 1)
    b3 = bias.astype(jnp.float32).reshape(1, c, 1)
    blk_in = c * tl * itemsize
    blk_f32 = c * tl * 4
    vmem = 4 * blk_in + 4 * blk_f32 + 2 * c * 4 + _VMEM_MARGIN_BYTES
    y3 = pl.pallas_call(
        functools.partial(_ln_cfirst_kernel, eps=eps, c=c),
        out_shape=jax.ShapeDtypeStruct((n, c, hw), x.dtype),
        grid_spec=pltpu.PrefetchScalarGridSpec(
            num_scalar_prefetch=0,
            grid=grid,
            in_specs=[
                pl.BlockSpec((1, c, tl), lambda i, j: (i, 0, j)),
                pl.BlockSpec((1, c, 1), lambda i, j: (0, 0, 0)),
                pl.BlockSpec((1, c, 1), lambda i, j: (0, 0, 0)),
            ],
            out_specs=pl.BlockSpec((1, c, tl), lambda i, j: (i, 0, j)),
        ),
        compiler_params=_compiler_params(("parallel", "parallel"), vmem),
    )(x3, w3, b3)
    return y3.reshape(n, c, h, w)


class LayerNormPallas:
    """Mirrors the PyTorch LayerNorm module (eps, data_format, affine params)."""

    def __init__(self, normalized_shape, eps=1e-6, data_format="channels_last"):
        if data_format not in ["channels_last", "channels_first"]:
            raise NotImplementedError
        self.eps = float(eps)
        self.data_format = data_format
        self.normalized_shape = normalized_shape
        # Deterministic, non-trivial parameters (synthetic; not a checkpoint load).
        kw, kb = jax.random.split(jax.random.PRNGKey(0))
        self.weight = 1.0 + 0.1 * jax.random.normal(kw, (normalized_shape,), jnp.float32)
        self.bias = 0.1 * jax.random.normal(kb, (normalized_shape,), jnp.float32)

    def __call__(self, x):
        if self.data_format == "channels_last":
            orig_shape = x.shape
            c = orig_shape[-1]
            y = _layernorm_channels_last(x.reshape(-1, c), self.weight, self.bias, self.eps)
            return y.reshape(orig_shape)
        # channels_first: (N, C, H, W); normalize over dim 1, native layout.
        return _layernorm_channels_first(x, self.weight, self.bias, self.eps)


# --------------------------------------------------------------------------- references

def _reference_channels_last(x, w, b, eps):
    mean = jnp.mean(x, axis=-1, keepdims=True)
    var = jnp.mean((x - mean) ** 2, axis=-1, keepdims=True)
    return (x - mean) / jnp.sqrt(var + eps) * w + b


def _reference_channels_first(x, w, b, eps):
    u = jnp.mean(x, axis=1, keepdims=True)
    s = jnp.mean((x - u) ** 2, axis=1, keepdims=True)
    xn = (x - u) / jnp.sqrt(s + eps)
    return w[:, None, None] * xn + b[:, None, None]


if __name__ == "__main__":
    key = jax.random.PRNGKey(0)
    k1, k2, k3, k4, k5 = jax.random.split(key, 5)

    # channels_last, C=32 -> lane-packed MXU path, rows divisible by G (no pad/slice).
    x_cl = jax.random.normal(k1, (2, 16, 16, 32), jnp.float32)
    ln_cl = LayerNormPallas(32, eps=1e-6, data_format="channels_last")
    y_cl = jax.block_until_ready(ln_cl(x_cl))
    ref_cl = _reference_channels_last(x_cl, ln_cl.weight, ln_cl.bias, 1e-6)
    assert y_cl.shape == x_cl.shape
    assert jnp.allclose(y_cl, ref_cl, atol=1e-4, rtol=1e-4)

    # channels_last, ragged row count (exercises the G-remainder pad + partial block).
    x_rag = jax.random.normal(k2, (3, 7, 5, 32), jnp.float32)
    y_rag = jax.block_until_ready(ln_cl(x_rag))
    ref_rag = _reference_channels_last(x_rag, ln_cl.weight, ln_cl.bias, 1e-6)
    assert jnp.allclose(y_rag, ref_rag, atol=1e-4, rtol=1e-4)

    # channels_last, C=256 -> already lane-dense, plain-row path.
    x_big = jax.random.normal(k3, (2, 8, 8, 256), jnp.float32)
    ln_big = LayerNormPallas(256, eps=1e-6, data_format="channels_last")
    y_big = jax.block_until_ready(ln_big(x_big))
    ref_big = _reference_channels_last(x_big, ln_big.weight, ln_big.bias, 1e-6)
    assert jnp.allclose(y_big, ref_big, atol=1e-4, rtol=1e-4)

    # channels_last, C=88 (EdgeNeXt-style, does not divide 128) -> rows fallback path.
    x_awk = jax.random.normal(k5, (2, 4, 4, 88), jnp.float32)
    ln_awk = LayerNormPallas(88, eps=1e-6, data_format="channels_last")
    y_awk = jax.block_until_ready(ln_awk(x_awk))
    ref_awk = _reference_channels_last(x_awk, ln_awk.weight, ln_awk.bias, 1e-6)
    assert jnp.allclose(y_awk, ref_awk, atol=1e-4, rtol=1e-4)

    # channels_first, (N, C, H, W) -> native path, no transposes, no padding.
    x_cf = jax.random.normal(k4, (2, 32, 16, 16), jnp.float32)
    ln_cf = LayerNormPallas(32, eps=1e-6, data_format="channels_first")
    y_cf = jax.block_until_ready(ln_cf(x_cf))
    ref_cf = _reference_channels_first(x_cf, ln_cf.weight, ln_cf.bias, 1e-6)
    assert y_cf.shape == x_cf.shape
    assert jnp.allclose(y_cf, ref_cf, atol=1e-4, rtol=1e-4)

    print("KERNEL_OK")
</pallas_src>

<mosaic_0001>
module attributes {stable_mosaic.version = 11 : i64} {
  func.func @_ln_packed_kernel(%arg0: i32, %arg1: memref<64x128xf32, #tpu.memory_space<vmem>>, %arg2: memref<1x128xf32, #tpu.memory_space<vmem>>, %arg3: memref<1x128xf32, #tpu.memory_space<vmem>>, %arg4: memref<128x128xbf16, #tpu.memory_space<vmem>>, %arg5: memref<64x128xf32, #tpu.memory_space<vmem>>) attributes {dimension_semantics = [#tpu.dimension_semantics<parallel>], iteration_bounds = array<i64: 2>, scalar_prefetch = 0 : i64, scratch_operands = 0 : i64, tpu.core_type = #tpu.core_type<tc>, window_params = [{transform_indices = @transform_0, window_bounds = array<i64: 64, 128>}, {pipeline_mode = #tpu.pipeline_mode<synchronous>, transform_indices = @transform_1, window_bounds = array<i64: 1, 128>}, {pipeline_mode = #tpu.pipeline_mode<synchronous>, transform_indices = @transform_2, window_bounds = array<i64: 1, 128>}, {pipeline_mode = #tpu.pipeline_mode<synchronous>, transform_indices = @transform_3, window_bounds = array<i64: 128, 128>}, {transform_indices = @transform_4, window_bounds = array<i64: 64, 128>}]} {
    %c0 = arith.constant 0 : index
    %c0_0 = arith.constant 0 : index
    %0 = vector.load %arg1[%c0, %c0_0] : memref<64x128xf32, #tpu.memory_space<vmem>>, vector<64x128xf32>
    %c0_1 = arith.constant 0 : index
    %c0_2 = arith.constant 0 : index
    %1 = vector.load %arg4[%c0_1, %c0_2] : memref<128x128xbf16, #tpu.memory_space<vmem>>, vector<128x128xbf16>
    %2 = arith.truncf %0 : vector<64x128xf32> to vector<64x128xbf16>
    %3 = arith.extf %2 : vector<64x128xbf16> to vector<64x128xf32>
    %4 = arith.subf %0, %3 : vector<64x128xf32>
    %5 = arith.truncf %4 : vector<64x128xf32> to vector<64x128xbf16>
    %cst = arith.constant dense<0.000000e+00> : vector<64x128xf32>
    %6 = tpu.matmul %2, %1, %cst {dimension_numbers = #tpu.dot_dimension_numbers<[1], [0], [0], [1], [0, 0, 1, 1], [], []>} : vector<64x128xbf16>, vector<128x128xbf16>, vector<64x128xf32> -> vector<64x128xf32>
    %cst_3 = arith.constant dense<0.000000e+00> : vector<64x128xf32>
    %7 = tpu.matmul %5, %1, %cst_3 {dimension_numbers = #tpu.dot_dimension_numbers<[1], [0], [0], [1], [0, 0, 1, 1], [], []>} : vector<64x128xbf16>, vector<128x128xbf16>, vector<64x128xf32> -> vector<64x128xf32>
    %8 = arith.addf %6, %7 : vector<64x128xf32>
    %9 = arith.mulf %0, %0 : vector<64x128xf32>
    %10 = arith.truncf %9 : vector<64x128xf32> to vector<64x128xbf16>
    %11 = arith.extf %10 : vector<64x128xbf16> to vector<64x128xf32>
    %12 = arith.subf %9, %11 : vector<64x128xf32>
    %13 = arith.truncf %12 : vector<64x128xf32> to vector<64x128xbf16>
    %cst_4 = arith.constant dense<0.000000e+00> : vector<64x128xf32>
    %14 = tpu.matmul %10, %1, %cst_4 {dimension_numbers = #tpu.dot_dimension_numbers<[1], [0], [0], [1], [0, 0, 1, 1], [], []>} : vector<64x128xbf16>, vector<128x128xbf16>, vector<64x128xf32> -> vector<64x128xf32>
    %cst_5 = arith.constant dense<0.000000e+00> : vector<64x128xf32>
    %15 = tpu.matmul %13, %1, %cst_5 {dimension_numbers = #tpu.dot_dimension_numbers<[1], [0], [0], [1], [0, 0, 1, 1], [], []>} : vector<64x128xbf16>, vector<128x128xbf16>, vector<64x128xf32> -> vector<64x128xf32>
    %16 = arith.addf %14, %15 : vector<64x128xf32>
    %cst_6 = arith.constant 3.125000e-02 : f32
    %17 = vector.broadcast %cst_6 : f32 to vector<64x128xf32>
    %18 = arith.mulf %8, %17 : vector<64x128xf32>
    %cst_7 = arith.constant 3.125000e-02 : f32
    %19 = vector.broadcast %cst_7 : f32 to vector<64x128xf32>
    %20 = arith.mulf %16, %19 : vector<64x128xf32>
    %21 = arith.mulf %18, %18 : vector<64x128xf32>
    %22 = arith.subf %20, %21 : vector<64x128xf32>
    %cst_8 = arith.constant 0.000000e+00 : f32
    %23 = vector.broadcast %cst_8 : f32 to vector<64x128xf32>
    %24 = arith.maximumf %22, %23 : vector<64x128xf32>
    %cst_9 = arith.constant 9.99999997E-7 : f32
    %25 = vector.broadcast %cst_9 : f32 to vector<64x128xf32>
    %26 = arith.addf %24, %25 : vector<64x128xf32>
    %27 = math.rsqrt %26 : vector<64x128xf32>
    %28 = arith.subf %0, %18 : vector<64x128xf32>
    %29 = arith.mulf %28, %27 : vector<64x128xf32>
    %c0_10 = arith.constant 0 : index
    %c0_11 = arith.constant 0 : index
    %30 = vector.load %arg2[%c0_10, %c0_11] : memref<1x128xf32, #tpu.memory_space<vmem>>, vector<1x128xf32>
    %31 = vector.broadcast %30 : vector<1x128xf32> to vector<64x128xf32>
    %32 = arith.mulf %29, %31 : vector<64x128xf32>
    %c0_12 = arith.constant 0 : index
    %c0_13 = arith.constant 0 : index
    %33 = vector.load %arg3[%c0_12, %c0_13] : memref<1x128xf32, #tpu.memory_space<vmem>>, vector<1x128xf32>
    %34 = vector.broadcast %33 : vector<1x128xf32> to vector<64x128xf32>
    %35 = arith.addf %32, %34 : vector<64x128xf32>
    %c0_14 = arith.constant 0 : index
    %c0_15 = arith.constant 0 : index
    %36 = vector.load %arg5[%c0_14, %c0_15] : memref<64x128xf32, #tpu.memory_space<vmem>>, vector<64x128xf32>
    tpu.vector_store %arg5[%c0_14, %c0_15], %35 {strides = array<i32>} : memref<64x128xf32, #tpu.memory_space<vmem>>, vector<64x128xf32>,
    return
  }
  func.func @transform_0(%arg0: i32) -> (i32, i32) {
    %c0_i32 = arith.constant 0 : i32
    %c0_i32_0 = arith.constant 0 : i32
    return %arg0, %c0_i32 : i32, i32
  }
  func.func @transform_1(%arg0: i32) -> (i32, i32) {
    %c0_i32 = arith.constant 0 : i32
    %c0_i32_0 = arith.constant 0 : i32
    %c0_i32_1 = arith.constant 0 : i32
    return %c0_i32, %c0_i32_0 : i32, i32
  }
  func.func @transform_2(%arg0: i32) -> (i32, i32) {
    %c0_i32 = arith.constant 0 : i32
    %c0_i32_0 = arith.constant 0 : i32
    %c0_i32_1 = arith.constant 0 : i32
    return %c0_i32, %c0_i32_0 : i32, i32
  }
  func.func @transform_3(%arg0: i32) -> (i32, i32) {
    %c0_i32 = arith.constant 0 : i32
    %c0_i32_0 = arith.constant 0 : i32
    %c0_i32_1 = arith.constant 0 : i32
    return %c0_i32, %c0_i32_0 : i32, i32
  }
  func.func @transform_4(%arg0: i32) -> (i32, i32) {
    %c0_i32 = arith.constant 0 : i32
    %c0_i32_0 = arith.constant 0 : i32
    return %arg0, %c0_i32 : i32, i32
  }
}

</mosaic_0001>

<bundles_post_ra>
// kernel: tpu_custom_call.1
= control target key start
LH: loop header
LB: loop body
LE: loop exit
PB: predicated region body
PF: predicated region fallthrough
CT: control target
= control target key end

     0   :  { %s1496_s0 = inlined_call_operand.hbm [shape: f32[128,128], index: 0, kind: input, shape index: {}]   ;;  %s1497_s1 = inlined_call_operand.hbm [shape: f32[1,128], index: 1, kind: input, shape index: {}]   ;;  %s1498_s2 = inlined_call_operand.vmem [shape: f32[1,128], index: 2, kind: input, shape index: {}]   ;;  %s1499_s3 = inlined_call_operand.hbm [shape: bf16[128,128], index: 3, kind: input, shape index: {}]   ;;  %s1500_s4 = inlined_call_operand.hbm [shape: f32[128,128], index: 4, kind: output, shape index: {}]  }
   0x1   :  { %1501 = sst [smem:[#allocation12_spill]] %s1497_s1 }
   0x2   :  { %1502 = sst [smem:[#allocation13_spill]] %s1499_s3 }
   0x3   :  { %9 = vsyncpa [#allocation3], 0 }
   0x4   :  { %11 = vsyncpa [#allocation3 + $0x1], 0 }
   0x5   :  { %12 = vsyncpa [#allocation6], 0 }
   0x6   :  { %13 = vsyncpa [#allocation4], 0 }
   0x7   :  { %15 = vsyncpa [#allocation4 + $0x1], 0  ;;  %s1181_s15 = smov 0   ;;  %s1183_s16 = smov 0  }
   0x8   :  { %s1185_s17 = smov 0   ;;  %s1187_s18 = smov 0  }
   0x9 LB: > { %s1202_s19 = sadd.s32 4294967295, %s1146_s18   ;;  %s835_s20 = sadd.s32 4294967294, %s1146_s18   ;;  %s1146_s18 = sphi %s1187_s18, %s1515_s18   ;;  %s1142_s17 = sphi %s1185_s17, %s1514_s17   ;;  %s1138_s16 = sphi %s1183_s16, %s1513_s16   ;;  %s1134_s15 = sphi %s1181_s15, %s1512_s15  }
   0xa   : > { %s1206_s21 = sadd.s32 1, %s1146_s18   ;;  %s28_s22 = sadd.s32 1, %s1142_s17 }
   0xb   : > { %s25_s23 = ssub.s32 %s1146_s18, %s1206_s21  ;;  %p35_p0 = scmp.ne.s32.totalorder %s1142_s17, %s1138_s16 }
   0xc   : > { %p26_p1 = scmp.eq.s32.totalorder %s25_s23, 0  ;;  %p36_p2 = scmp.eq.s32.totalorder %s1146_s18, 0 }
   0xd   : > { %p41_p3 = scmp.ne.s32.totalorder %s1138_s16, %s1134_s15  ;;  %p42_p4 = scmp.eq.s32.totalorder %s1202_s19, 0 }
   0xe   : > { %s1218_s24 = scalar_select %p26_p1, %s1142_s17, %s28_s22  }
   0xf   : > { %p1220_p5 = por %p36_p2, %p35_p0  ;;  %p1226_p6 = por %p42_p4, %p41_p3 }
  0x10   : > { %p128_p7 = scmp.eq.s32.totalorder %s1202_s19, 1  ;;  %p134_p8 = scmp.eq.s32.totalorder %s835_s20, 1 }
  0x11   : > { %p836_p9 = scmp.ge.s32.totalorder %s1146_s18, 1  ;;  %p141_p10 = scmp.lt.s32.totalorder %s1146_s18, 3 }
  0x12   : > { %p1233_p11 = por %p128_p7, %p35_p0  ;;  %p1237_p12 = por %p134_p8, %p41_p3 }
  0x13   : > { %p1241_p13 = pnand %p836_p9, %p141_p10  ;;  %s1508_s1 = sld [smem:[#allocation12_spill]] }
  0x14   : > { %s1148_s7 = smov [#allocation5]   ;;  %p924_p3 = scmp.lt.s32.totalorder %s1146_s18, 2 }
  0x15   : > { %p907_p1 = pneg %p1241_p13  ;;  %s155_s8 = sshll.u32 %s1148_s7, 4  ;;  %s156_s8 = int_to_ptr.vmem [resolvable:$true] %s155_s8 }
  0x16   : > { %s1509_s3 = sld [smem:[#allocation13_spill]]  ;;  %p1259_p7 = pnand %p924_p3, %p1220_p5 }
  0x17   : > { %p908_p2 = pnand %p907_p1, %p42_p4  ;;  %s1149_s13 = smov [#allocation7]  }
  0x18   : > { %s169_s14 = sshll.u32 %s1149_s13, 4  ;;  %s183_s20 = sand.u32 1, %s1142_s17   ;;  %s170_s14 = int_to_ptr.vmem [resolvable:$true] %s169_s14 }
  0x19   : > { %s153_s6 = sshll.u32 %s1508_s1, 4  ;;  %s1150_s22 = smov 64   ;;  %s154_s6 = int_to_ptr.hbm [resolvable:$true] %s153_s6 }
  0x1a   : > { %910 = dma.hbm_to_vmem [thread:$0]  (!%p908_p2), %s154_s6, 16, %s156_s8, [#allocation6]  }
  0x1b   : > { %s1151_s23 = smov 4   ;;  %s840_s30 = sshll.u32 %s183_s20, 6 }
  0x1c   : > { %s167_s11 = sshll.u32 %s1509_s3, 4  ;;  %s885_s5 = sshll.u32 %s1146_s18, 6  ;;  %s168_s11 = int_to_ptr.hbm [resolvable:$true] %s167_s11 }
  0x1d   : > { %913 = dma.hbm_to_vmem [thread:$0]  (!%p908_p2), %s168_s11, 1024, %s170_s14, [#allocation6], %s1150_s22, %s1150_s22, %s1151_s23  }
  0x1e   : > { %s192_s10 = scalar_lea.hbm %s1496_s0, %s885_s5  ;;  %s187_s6 = scalar_lea.vmem [#allocation2], %s840_s30 }
  0x1f   : > { %s195_s25 = sshll.u32 %s187_s6, 4  ;;  %s193_s8 = sshll.u32 %s192_s10, 4  ;;  %s196_s25 = int_to_ptr.vmem [resolvable:$true] %s195_s25  ;;  %s194_s8 = int_to_ptr.hbm [resolvable:$true] %s193_s8 }
  0x20   : > { %s184_s1 = scalar_lea.sflag [#allocation3], %s183_s20  ;;  %s1046_s3 = sshra.s32 %s194_s8, 4  ;;  %s1047_s3 = int_to_ptr.hbm [resolvable:$true] %s1046_s3 }
  0x21   : > { %s1048_s13 = scalar_lea.hbm %s1047_s3, 64  ;;  %p1050_p8 = pneg %p1259_p7 }
  0x22   : > { %p1049_p5 = scmp.ne.s32.totalorder %s1047_s3, %s1048_s13  ;;  %s1053_s22 = scalar_lea.hbm %s1496_s0, 128 }
  0x23   : > { %p1054_p1 = scmp.lt.s32.totalorder %s1047_s3, %s1496_s0  ;;  %p1055_p2 = scmp.lt.s32.totalorder %s1053_s22, %s1048_s13 }
  0x24   : > { %p1051_p9 = pnand %p1050_p8, %p1049_p5 }
  0x25   : > { %p1056_p3 = por %p1055_p2, %p1054_p1 }
  0x26   : > { %p1052_p10 = pneg %p1051_p9 }
  0x28   : > { %p1057_p0 = pnand %p1056_p3, %p1052_p10 }
  0x2a   : > { %1060 = shalt.err (!%p1057_p0)
}
  0x2b   : > { %s1152_s20 = smov 128   ;;  %s1153_s30 = smov 8  }
  0x2c   : > { %917 = dma.hbm_to_vmem [thread:$0]  (!%p1259_p7), %s194_s8, 1024, %s196_s25, %s184_s1, %s1152_s20, %s1152_s20, %s1153_s30  }
  0x2d   : > { %207 = sbr.rel (%p1241_p13) target bundleno = 312 (0x138), region = 36  ;;  %s1281_s7 = sand.u32 (!%p1241_p13), 1, %s1138_s16  }
  0x2e   : > { %s844_s3 = sshll.u32 (!%p1241_p13), %s1281_s7, 6  ;;  %s210_s9 = scalar_lea.sflag (!%p1241_p13), [#allocation3], %s1281_s7 }
  0x2f   : > { %s1287_s10 = scalar_lea.vmem (!%p1241_p13), [#allocation2], %s844_s3 }
  0x32   : > { %1121 = dma.done.wait (%p1226_p6), %s210_s9, 1024  }
  0x33   : > { %1123 = vsyncadd (%p1226_p6), %s210_s9, 4294966272 }
  0x34   : > { %1125 = dma.done.wait (%p42_p4), [#allocation6], 1040  }
  0x35   : > { %1127 = vsyncadd (%p42_p4), [#allocation6], 4294966256  ;;  %v893_v0 = vld [vmem:[#allocation7 + $0x38] sm:$0xff]  ;;  %v892_v1 = vld [vmem:[#allocation7 + $0x30] sm:$0xff]  ;;  %s1400_s29 = scalar_lea.vmem [#allocation8], %s844_s3  ;;  %s894_s12 = sshll.u32 %s1202_s19, 6 }
  0x36   : > { %351 = vmatpush.bf16.msra.mxu0 %v893_v0  ;;  %404 = vmatpush.bf16.msra.mxu1 %v893_v0  ;;  %v891_v2 = vld [vmem:[#allocation7 + $0x28] sm:$0xff]  ;;  %v890_v3 = vld [vmem:[#allocation7 + $0x20] sm:$0xff]  ;;  %v889_v6 = vld [vmem:[#allocation7 + $0x18] sm:$0xff]  ;;  %s739_s8 = scalar_lea.hbm %s1500_s4, %s894_s12  ;;  %s740_s19 = sshll.u32 %s1400_s29, 4  ;;  %s741_s19 = int_to_ptr.vmem [resolvable:$true] %s740_s19 }
  0x37   : > { %469 = vmatpush.bf16.msra.mxu2 %v893_v0  ;;  %522 = vmatpush.bf16.msra.mxu3 %v893_v0  ;;  %v1298_v4 = vld [vmem:[%s1287_s10] sm:$0xff]  ;;  %v1301_v5 = vld [vmem:[%s1287_s10 + $0x8] sm:$0xff]  ;;  %v888_v11 = vld [vmem:[#allocation7 + $0x10] sm:$0xff]  ;;  %s742_s13 = sshll.u32 %s739_s8, 4  ;;  %s728_s11 = scalar_lea.sflag [#allocation4], %s1281_s7  ;;  %s743_s13 = int_to_ptr.hbm [resolvable:$true] %s742_s13 }
  0x38   : > { %v433_v7 = vmul.f32 %v1298_v4, %v1298_v4  ;;  %v434_v8 = vmul.f32 %v1301_v5, %v1301_v5  ;;  %v275_v9 = vpack.c.bf16 %v1298_v4, %v1298_v4  ;;  %v276_v10 = vpack.c.bf16 %v1301_v5, %v1301_v5  ;;  %v887_v16 = vld [vmem:[#allocation7 + $0x8] sm:$0xff]  ;;  %v886_v23 = vld [vmem:[#allocation7] sm:$0xff]  ;;  %v1317_v29 = vld [vmem:[%s1287_s10 + $0x18] sm:$0xff]  ;;  %s1090_s14 = sshra.s32 %s743_s13, 4  ;;  %s1096_s20 = scalar_lea.hbm %s1500_s4, 128  ;;  %s1091_s14 = int_to_ptr.hbm [resolvable:$true] %s1090_s14 }
  0x39   : > { %v1314_v28 = vld [vmem:[%s1287_s10 + $0x10] sm:$0xff]  ;;  %v436_v35 = vmul.f32 %v1317_v29, %v1317_v29  ;;  %v278_v37 = vpack.c.bf16 %v1317_v29, %v1317_v29  ;;  %v1330_v52 = vld [vmem:[%s1287_s10 + $0x20] sm:$0xff]  ;;  %v1333_v53 = vld [vmem:[%s1287_s10 + $0x28] sm:$0xff]  ;;  %s1092_s22 = scalar_lea.hbm %s1091_s14, 64  ;;  %p1097_p0 = scmp.lt.s32.totalorder %s1091_s14, %s1500_s4 }
  0x3a   : > { %352 = vmatpush.bf16.msra.mxu0 %v892_v1  ;;  %405 = vmatpush.bf16.msra.mxu1 %v892_v1  ;;  %v441_v12 = vpack.c.bf16 %v433_v7, %v433_v7  ;;  %v442_v13 = vpack.c.bf16 %v434_v8, %v434_v8  ;;  %v283_v14 = vunpack.c.l.bf16 %v275_v9  ;;  %v284_v15 = vunpack.c.l.bf16 %v276_v10  ;;  %p1093_p4 = scmp.ne.s32.totalorder %s1091_s14, %s1092_s22  ;;  %p1098_p7 = scmp.lt.s32.totalorder %s1096_s20, %s1092_s22 }
  0x3b   : > { %470 = vmatpush.bf16.msra.mxu2 %v892_v1  ;;  %523 = vmatpush.bf16.msra.mxu3 %v892_v1  ;;  %v388_v21 = vunpack.c.l.b16 %v275_v9  ;;  %v389_v22 = vunpack.c.l.b16 %v276_v10  ;;  %v435_v32 = vmul.f32 %v1314_v28, %v1314_v28  ;;  %v277_v36 = vpack.c.bf16 %v1314_v28, %v1314_v28 }
  0x3c   : > { %v449_v17 = vunpack.c.l.bf16 %v441_v12  ;;  %v450_v18 = vunpack.c.l.bf16 %v442_v13  ;;  %v291_v19 = vsub.f32 %v1298_v4, %v283_v14  ;;  %v292_v20 = vsub.f32 %v1301_v5, %v284_v15  ;;  %v1346_v14 = vld [vmem:[%s1287_s10 + $0x30] sm:$0xff]  ;;  %v1349_v15 = vld [vmem:[%s1287_s10 + $0x38] sm:$0xff]  ;;  %p1094_p6 = pnand %p1093_p4, %p1233_p11  ;;  %p1099_p5 = por %p1098_p7, %p1097_p0 }
  0x3d   : > { %v506_v26 = vunpack.c.l.b16 %v441_v12  ;;  %v507_v27 = vunpack.c.l.b16 %v442_v13  ;;  %v396_v31 = vpack.c.b16 %v389_v22, %v388_v21  ;;  %v443_v38 = vpack.c.bf16 %v435_v32, %v435_v32 }
  0x3e   : > { %353 = vmatpush.bf16.msra.mxu0 %v891_v2  ;;  %406 = vmatpush.bf16.msra.mxu1 %v891_v2  ;;  %v457_v24 = vsub.f32 %v433_v7, %v449_v17  ;;  %v458_v25 = vsub.f32 %v434_v8, %v450_v18  ;;  %v299_v30 = vpack.c.bf16 %v292_v20, %v291_v19  ;;  %v285_v40 = vunpack.c.l.bf16 %v277_v36  ;;  %p1095_p13 = pneg %p1094_p6 }
  0x3f   : > { %471 = vmatpush.bf16.msra.mxu2 %v891_v2  ;;  %524 = vmatpush.bf16.msra.mxu3 %v891_v2  ;;  %v514_v34 = vpack.c.b16 %v507_v27, %v506_v26  ;;  %v444_v39 = vpack.c.bf16 %v436_v35, %v436_v35  ;;  %v286_v41 = vunpack.c.l.bf16 %v278_v37  ;;  %v451_v42 = vunpack.c.l.bf16 %v443_v38 }
  0x40   : > { %v465_v33 = vpack.c.bf16 %v458_v25, %v457_v24  ;;  %v293_v44 = vsub.f32 %v1314_v28, %v285_v40  ;;  %v390_v46 = vunpack.c.l.b16 %v277_v36  ;;  %v391_v47 = vunpack.c.l.b16 %v278_v37  ;;  %p1100_p8 = pnand %p1099_p5, %p1095_p13 }
  0x41   : > { %v452_v43 = vunpack.c.l.bf16 %v444_v39  ;;  %v294_v45 = vsub.f32 %v1317_v29, %v286_v41  ;;  %v459_v48 = vsub.f32 %v435_v32, %v451_v42  ;;  %v508_v50 = vunpack.c.l.b16 %v443_v38 }
  0x42   : > { %354 = vmatpush.bf16.msra.mxu0 %v890_v3  ;;  %407 = vmatpush.bf16.msra.mxu1 %v890_v3  ;;  %v509_v51 = vunpack.c.l.b16 %v444_v39  ;;  %v397_v55 = vpack.c.b16 %v391_v47, %v390_v46  ;;  %v437_v58 = vmul.f32 %v1330_v52, %v1330_v52  ;;  %v438_v59 = vmul.f32 %v1333_v53, %v1333_v53 }
  0x43   : > { %472 = vmatpush.bf16.msra.mxu2 %v890_v3  ;;  %525 = vmatpush.bf16.msra.mxu3 %v890_v3  ;;  %v460_v49 = vsub.f32 %v436_v35, %v452_v43  ;;  %v300_v54 = vpack.c.bf16 %v294_v45, %v293_v44  ;;  %v279_v60 = vpack.c.bf16 %v1330_v52, %v1330_v52 }
  0x44   : > { %v515_v57 = vpack.c.b16 %v509_v51, %v508_v50  ;;  %v280_v61 = vpack.c.bf16 %v1333_v53, %v1333_v53  ;;  %v445_v62 = vpack.c.bf16 %v437_v58, %v437_v58  ;;  %v446_v63 = vpack.c.bf16 %v438_v59, %v438_v59 }
  0x45   : > { %v466_v56 = vpack.c.bf16 %v460_v49, %v459_v48  ;;  %v287_v0 = vunpack.c.l.bf16 %v279_v60  ;;  %v392_v8 = vunpack.c.l.b16 %v279_v60  ;;  %v439_v20 = vmul.f32 %v1346_v14, %v1346_v14 }
  0x46   : > { %355 = vmatpush.bf16.msra.mxu0 %v889_v6  ;;  %408 = vmatpush.bf16.msra.mxu1 %v889_v6  ;;  %v288_v1 = vunpack.c.l.bf16 %v280_v61  ;;  %v453_v2 = vunpack.c.l.bf16 %v445_v62  ;;  %v454_v3 = vunpack.c.l.bf16 %v446_v63  ;;  %v393_v9 = vunpack.c.l.b16 %v280_v61 }
  0x47   : > { %473 = vmatpush.bf16.msra.mxu2 %v889_v6  ;;  %526 = vmatpush.bf16.msra.mxu3 %v889_v6  ;;  %v295_v6 = vsub.f32 %v1330_v52, %v287_v0  ;;  %v510_v12 = vunpack.c.l.b16 %v445_v62  ;;  %v511_v13 = vunpack.c.l.b16 %v446_v63  ;;  %v440_v21 = vmul.f32 %v1349_v15, %v1349_v15 }
  0x48   : > { %v296_v7 = vsub.f32 %v1333_v53, %v288_v1  ;;  %v461_v10 = vsub.f32 %v437_v58, %v453_v2  ;;  %v398_v17 = vpack.c.b16 %v393_v9, %v392_v8  ;;  %v281_v22 = vpack.c.bf16 %v1346_v14, %v1346_v14 }
  0x49   : > { %v516_v19 = vpack.c.b16 %v511_v13, %v510_v12  ;;  %v447_v24 = vpack.c.bf16 %v439_v20, %v439_v20  ;;  %v448_v25 = vpack.c.bf16 %v440_v21, %v440_v21 }
  0x4a   : > { %356 = vmatpush.bf16.msra.mxu0 %v888_v11  ;;  %409 = vmatpush.bf16.msra.mxu1 %v888_v11  ;;  %v289_v26 = vunpack.c.l.bf16 %v281_v22 }
  0x4b   : > { %474 = vmatpush.bf16.msra.mxu2 %v888_v11  ;;  %527 = vmatpush.bf16.msra.mxu3 %v888_v11  ;;  %v462_v11 = vsub.f32 %v438_v59, %v454_v3  ;;  %v512_v38 = vunpack.c.l.b16 %v447_v24  ;;  %v513_v39 = vunpack.c.l.b16 %v448_v25 }
  0x4c   : > { %v297_v32 = vsub.f32 %v1346_v14, %v289_v26 }
  0x4d   : > { %v467_v18 = vpack.c.bf16 %v462_v11, %v461_v10  ;;  %v517_v43 = vpack.c.b16 %v513_v39, %v512_v38 }
  0x4e   : > { %357 = vmatpush.bf16.msra.mxu0 %v887_v16  ;;  %410 = vmatpush.bf16.msra.mxu1 %v887_v16 }
  0x4f   : > { %475 = vmatpush.bf16.msra.mxu2 %v887_v16  ;;  %528 = vmatpush.bf16.msra.mxu3 %v887_v16  ;;  %v301_v16 = vpack.c.bf16 %v296_v7, %v295_v6 }
  0x52   : > { %358 = vmatpush.bf16.msra.mxu0 %v886_v23  ;;  %411 = vmatpush.bf16.msra.mxu1 %v886_v23 }
  0x53   : > { %476 = vmatpush.bf16.msra.mxu2 %v886_v23  ;;  %529 = vmatpush.bf16.msra.mxu3 %v886_v23  ;;  %v282_v23 = vpack.c.bf16 %v1349_v15, %v1349_v15 }
  0x55   : > { %359 = vmatmul.bf16.vlgmr.msra.gmra.mxu0 %v299_v30  ;;  %412 = vmatmul.bf16.vlgmr.msra.gmra.mxu1 %v396_v31  ;;  %v290_v27 = vunpack.c.l.bf16 %v282_v23  ;;  %v455_v30 = vunpack.c.l.bf16 %v447_v24  ;;  %v456_v31 = vunpack.c.l.bf16 %v448_v25  ;;  %v395_v35 = vunpack.c.l.b16 %v282_v23 }
  0x56   : > { %477 = vmatmul.bf16.vlgmr.msra.gmra.mxu2 %v465_v33  ;;  %530 = vmatmul.bf16.vlgmr.msra.gmra.mxu3 %v514_v34  ;;  %v394_v34 = vunpack.c.l.b16 %v281_v22 }
  0x57   : > { %v298_v33 = vsub.f32 %v1349_v15, %v290_v27  ;;  %v463_v36 = vsub.f32 %v439_v20, %v455_v30  ;;  %v464_v37 = vsub.f32 %v440_v21, %v456_v31 }
  0x58   : > { %v399_v41 = vpack.c.b16 %v395_v35, %v394_v34 }
  0x59   : > { %v302_v40 = vpack.c.bf16 %v298_v33, %v297_v32  ;;  %v468_v42 = vpack.c.bf16 %v464_v37, %v463_v36 }
  0x65   : > { %364 = vmatmul.bf16.gmra.mxu0 %v300_v54  ;;  %417 = vmatmul.bf16.gmra.mxu1 %v397_v55 }
  0x66   : > { %482 = vmatmul.bf16.gmra.mxu2 %v466_v56  ;;  %535 = vmatmul.bf16.gmra.mxu3 %v515_v57 }
  0x75   : > { %369 = vmatmul.bf16.gmra.mxu0 %v301_v16  ;;  %422 = vmatmul.bf16.gmra.mxu1 %v398_v17 }
  0x76   : > { %487 = vmatmul.bf16.gmra.mxu2 %v467_v18  ;;  %540 = vmatmul.bf16.gmra.mxu3 %v516_v19 }
  0x85   : > { %374 = vmatmul.bf16.gmra.mxu0 %v302_v40  ;;  %427 = vmatmul.bf16.gmra.mxu1 %v399_v41 }
  0x86   : > { %492 = vmatmul.bf16.gmra.mxu2 %v468_v42  ;;  %545 = vmatmul.bf16.gmra.mxu3 %v517_v43  ;;  %v1379_v43 = vld [vmem:[#allocation5] ss:$0 sm:$0xff] }
  0xd2   : > { %v360_v44 = vpop.f32.mrf.mxu0  ;;  %v413_v45 = vpop.f32.mrf.mxu1 }
  0xd3   : > { %v414_v46 = vadd.f32 %v413_v45, %v360_v44 }
  0xd5   : > { %v1361_v47 = vmul.f32 0.03125, %v414_v46 }
  0xd7   : > { %v567_v50 = vmul.f32 %v1361_v47, %v1361_v47  ;;  %v679_v42 = vsub.f32 %v1298_v4, %v1361_v47 }
  0xd9   : > { %v478_v48 = vpop.f32.mrf.mxu2  ;;  %v531_v49 = vpop.f32.mrf.mxu3 }
  0xda   : > { %v532_v51 = vadd.f32 %v531_v49, %v478_v48  ;;  %v362_v54 = vpop.f32.mrf.mxu0  ;;  %v415_v55 = vpop.f32.mrf.mxu1 }
  0xdb   : > { %v416_v57 = vadd.f32 %v415_v55, %v362_v54 }
  0xdc   : > { %v559_v56 = vmul.f32 0.03125, %v532_v51 }
  0xdd   : > { %v1365_v60 = vmul.f32 0.03125, %v416_v57 }
  0xde   : > { %v575_v58 = vsub.f32 %v559_v56, %v567_v50  ;;  %v1387_v50 = vld [vmem:[%s1498_s2] ss:$0 sm:$0xff] }
  0xdf   : > { %v568_v6 = vmul.f32 %v1365_v60, %v1365_v60 }
  0xe0   : > { %v583_v59 = vmax.f32 %v575_v58, 0.0 }
  0xe1   : > { %v480_v61 = vpop.f32.mrf.mxu2  ;;  %v533_v62 = vpop.f32.mrf.mxu3 }
  0xe2   : > { %v591_v63 = vadd.f32 1e-06, %v583_v59  ;;  %v534_v0 = vadd.f32 %v533_v62, %v480_v61  ;;  %v365_v1 = vpop.f32.mrf.mxu0  ;;  %v418_v2 = vpop.f32.mrf.mxu1 }
  0xe3   : > { %v419_v3 = vadd.f32 %v418_v2, %v365_v1 }
  0xe4   : > { %970 = vrsqrt.f32 %v591_v63  ;;  %v560_v7 = vmul.f32 0.03125, %v534_v0  ;;  %vm605_vm1 = vweird.f32 %v591_v63 }
  0xe5   : > { %v1369_v9 = vmul.f32 0.03125, %v419_v3 }
  0xe6   : > { %v576_v8 = vsub.f32 %v560_v7, %v568_v6  ;;  %v680_v7 = vsub.f32 %v1301_v5, %v1365_v60 }
  0xe7   : > { %v569_v17 = vmul.f32 %v1369_v9, %v1369_v9 }
  0xe8   : > { %v584_v10 = vmax.f32 %v576_v8, 0.0 }
  0xe9   : > { %v483_v11 = vpop.f32.mrf.mxu2  ;;  %v536_v12 = vpop.f32.mrf.mxu3 }
  0xea   : > { %v971_v13 = vpop.eup %970  ;;  %v592_v16 = vadd.f32 1e-06, %v584_v10  ;;  %v537_v18 = vadd.f32 %v536_v12, %v483_v11  ;;  %v367_v19 = vpop.f32.mrf.mxu0 }
  0xeb   : > { %v420_v20 = vpop.f32.mrf.mxu1  ;;  %v600_v21 = vmul.f32 %v971_v13, %v591_v63  ;;  %vm606_vm0 = vweird.f32 %v971_v13 }
  0xec   : > { %972 = vrsqrt.f32 %v592_v16  ;;  %v561_v22 = vmul.f32 0.03125, %v537_v18  ;;  %v421_v23 = vadd.f32 %v420_v20, %v367_v19  ;;  %vm607_vm2 = vmor %vm605_vm1, %vm606_vm0  ;;  %vm615_vm4 = vweird.f32 %v592_v16 }
  0xed   : > { %v601_v24 = vmul.f32 %v971_v13, %v600_v21 }
  0xee   : > { %v577_v25 = vsub.f32 %v561_v22, %v569_v17  ;;  %v1373_v30 = vmul.f32 0.03125, %v421_v23 }
  0xef   : > { %v602_v26 = vmul.f32 0.5, %v601_v24 }
  0xf0   : > { %v585_v27 = vmax.f32 %v577_v25, 0.0  ;;  %v570_v44 = vmul.f32 %v1373_v30, %v1373_v30 }
  0xf1   : > { %v603_v31 = vsub.f32 1.5, %v602_v26  ;;  %v485_v32 = vpop.f32.mrf.mxu2  ;;  %v538_v33 = vpop.f32.mrf.mxu3 }
  0xf2   : > { %v973_v34 = vpop.eup %972  ;;  %v1375_v35 = vadd.f32 1e-06, %v585_v27  ;;  %v539_v36 = vadd.f32 %v538_v33, %v485_v32  ;;  %v370_v37 = vpop.f32.mrf.mxu0 }
  0xf3   : > { %v423_v38 = vpop.f32.mrf.mxu1  ;;  %v604_v39 = vmul.f32 %v971_v13, %v603_v31  ;;  %v610_v40 = vmul.f32 %v973_v34, %v592_v16  ;;  %vm616_vm3 = vweird.f32 %v973_v34 }
  0xf4   : > { %v424_v41 = vadd.f32 %v423_v38, %v370_v37  ;;  %974 = vrsqrt.f32 %v1375_v35  ;;  %v562_v45 = vmul.f32 0.03125, %v539_v36  ;;  %vm617_vm5 = vmor %vm615_vm4, %vm616_vm3  ;;  %vm625_vm7 = vweird.f32 %v1375_v35 }
  0xf5   : > { %v608_v46 = vsel %vm607_vm2, %v971_v13, %v604_v39  ;;  %v611_v48 = vmul.f32 %v973_v34, %v610_v40 }
  0xf6   : > { %v687_v49 = vmul.f32 %v679_v42, %v608_v46  ;;  %v578_v51 = vsub.f32 %v562_v45, %v570_v44  ;;  %v1389_v54 = vmul.f32 0.03125, %v424_v41 }
  0xf7   : > { %v612_v4 = vmul.f32 0.5, %v611_v48 }
  0xf8   : > { %v699_v47 = vmul.f32 %v1379_v43, %v687_v49  ;;  %v586_v55 = vmax.f32 %v578_v51, 0.0  ;;  %v571_v63 = vmul.f32 %v1389_v54, %v1389_v54 }
  0xf9   : > { %v613_v56 = vsub.f32 1.5, %v612_v4  ;;  %v488_v57 = vpop.f32.mrf.mxu2  ;;  %v541_v58 = vpop.f32.mrf.mxu3 }
  0xfa   : > { %v975_v59 = vpop.eup %974  ;;  %v711_v61 = vadd.f32 %v1387_v50, %v699_v47  ;;  %v1393_v62 = vadd.f32 1e-06, %v586_v55  ;;  %v542_v0 = vadd.f32 %v541_v58, %v488_v57  ;;  %v372_v1 = vpop.f32.mrf.mxu0 }
  0xfb   : > { %v425_v2 = vpop.f32.mrf.mxu1  ;;  %v614_v3 = vmul.f32 %v973_v34, %v613_v56  ;;  %v620_v6 = vmul.f32 %v975_v59, %v1375_v35  ;;  %vm626_vm6 = vweird.f32 %v975_v59 }
  0xfc   : > { %719 = vst [vmem:[%s1400_s29] sm:$0xff] %v711_v61  ;;  %976 = vrsqrt.f32 %v1393_v62  ;;  %v563_v8 = vmul.f32 0.03125, %v542_v0  ;;  %v426_v10 = vadd.f32 %v425_v2, %v372_v1  ;;  %vm627_vm8 = vmor %vm625_vm7, %vm626_vm6  ;;  %vm635_vm10 = vweird.f32 %v1393_v62 }
  0xfd   : > { %v618_v11 = vsel %vm617_vm5, %v973_v34, %v614_v3  ;;  %v621_v12 = vmul.f32 %v975_v59, %v620_v6  ;;  %v681_v34 = vsub.f32 %v1314_v28, %v1369_v9 }
  0xfe   : > { %v688_v13 = vmul.f32 %v680_v7, %v618_v11  ;;  %v579_v16 = vsub.f32 %v563_v8, %v571_v63  ;;  %v1408_v20 = vmul.f32 0.03125, %v426_v10 }
  0xff   : > { %v622_v17 = vmul.f32 0.5, %v621_v12 }
 0x100   : > { %v700_v18 = vmul.f32 %v1379_v43, %v688_v13  ;;  %v587_v19 = vmax.f32 %v579_v16, 0.0  ;;  %v572_v36 = vmul.f32 %v1408_v20, %v1408_v20 }
 0x101   : > { %v623_v21 = vsub.f32 1.5, %v622_v17  ;;  %v490_v5 = vpop.f32.mrf.mxu2  ;;  %v543_v60 = vpop.f32.mrf.mxu3 }
 0x102   : > { %v977_v22 = vpop.eup %976  ;;  %v712_v23 = vadd.f32 %v1387_v50, %v700_v18  ;;  %v1411_v24 = vadd.f32 1e-06, %v587_v19  ;;  %v544_v25 = vadd.f32 %v543_v60, %v490_v5  ;;  %v375_v26 = vpop.f32.mrf.mxu0  ;;  %v683_v19 = vsub.f32 %v1330_v52, %v1389_v54 }
 0x103   : > { %v428_v27 = vpop.f32.mrf.mxu1  ;;  %v624_v31 = vmul.f32 %v975_v59, %v623_v21  ;;  %v630_v32 = vmul.f32 %v977_v22, %v1393_v62  ;;  %vm636_vm9 = vweird.f32 %v977_v22 }
 0x104   : > { %v429_v33 = vadd.f32 %v428_v27, %v375_v26  ;;  %720 = vst [vmem:[%s1400_s29 + $0x8] sm:$0xff] %v712_v23  ;;  %978 = vrsqrt.f32 %v1411_v24  ;;  %v564_v37 = vmul.f32 0.03125, %v544_v25  ;;  %vm637_vm11 = vmor %vm635_vm10, %vm636_vm9  ;;  %vm645_vm13 = vweird.f32 %v1411_v24 }
 0x105   : > { %v628_v38 = vsel %vm627_vm8, %v975_v59, %v624_v31  ;;  %v631_v39 = vmul.f32 %v977_v22, %v630_v32  ;;  %v682_v59 = vsub.f32 %v1317_v29, %v1373_v30 }
 0x106   : > { %v689_v40 = vmul.f32 %v681_v34, %v628_v38  ;;  %v580_v41 = vsub.f32 %v564_v37, %v572_v36  ;;  %v1422_v35 = vmul.f32 0.03125, %v429_v33  ;;  %v684_v36 = vsub.f32 %v1333_v53, %v1408_v20 }
 0x107   : > { %v632_v42 = vmul.f32 0.5, %v631_v39 }
 0x108   : > { %v701_v44 = vmul.f32 %v1379_v43, %v689_v40  ;;  %v588_v45 = vmax.f32 %v580_v41, 0.0  ;;  %v573_v4 = vmul.f32 %v1422_v35, %v1422_v35  ;;  %v685_v53 = vsub.f32 %v1346_v14, %v1422_v35 }
 0x109   : > { %v633_v28 = vsub.f32 1.5, %v632_v42  ;;  %v493_v9 = vpop.f32.mrf.mxu2  ;;  %v546_v46 = vpop.f32.mrf.mxu3 }
 0x10a   : > { %v979_v48 = vpop.eup %978  ;;  %v713_v49 = vadd.f32 %v1387_v50, %v701_v44  ;;  %v596_v51 = vadd.f32 1e-06, %v588_v45  ;;  %v547_v47 = vadd.f32 %v546_v46, %v493_v9  ;;  %v377_v55 = vpop.f32.mrf.mxu0 }
 0x10b   : > { %v430_v56 = vpop.f32.mrf.mxu1  ;;  %v634_v57 = vmul.f32 %v977_v22, %v633_v28  ;;  %v640_v58 = vmul.f32 %v979_v48, %v1411_v24  ;;  %vm646_vm12 = vweird.f32 %v979_v48 }
 0x10c   : > { %721 = vst [vmem:[%s1400_s29 + $0x10] sm:$0xff] %v713_v49  ;;  %980 = vrsqrt.f32 %v596_v51  ;;  %v565_v61 = vmul.f32 0.03125, %v547_v47  ;;  %v431_v63 = vadd.f32 %v430_v56, %v377_v55  ;;  %vm647_vm14 = vmor %vm645_vm13, %vm646_vm12  ;;  %vm655_vm0 = vweird.f32 %v596_v51 }
 0x10d   : > { %v638_v0 = vsel %vm637_vm11, %v977_v22, %v634_v57  ;;  %v641_v1 = vmul.f32 %v979_v48, %v640_v58 }
 0x10e   : > { %v690_v2 = vmul.f32 %v682_v59, %v638_v0  ;;  %v581_v3 = vsub.f32 %v565_v61, %v573_v4  ;;  %v1435_v8 = vmul.f32 0.03125, %v431_v63 }
 0x10f   : > { %v642_v6 = vmul.f32 0.5, %v641_v1 }
 0x110   : > { %v702_v7 = vmul.f32 %v1379_v43, %v690_v2  ;;  %v589_v62 = vmax.f32 %v581_v3, 0.0  ;;  %v574_v21 = vmul.f32 %v1435_v8, %v1435_v8  ;;  %v686_v14 = vsub.f32 %v1349_v15, %v1435_v8 }
 0x111   : > { %v643_v10 = vsub.f32 1.5, %v642_v6  ;;  %v495_v11 = vpop.f32.mrf.mxu2  ;;  %v548_v29 = vpop.f32.mrf.mxu3 }
 0x112   : > { %v981_v30 = vpop.eup %980  ;;  %v714_v12 = vadd.f32 %v1387_v50, %v702_v7  ;;  %v597_v13 = vadd.f32 1e-06, %v589_v62  ;;  %v549_v16 = vadd.f32 %v548_v29, %v495_v11 }
 0x113   : > { %v644_v17 = vmul.f32 %v979_v48, %v643_v10  ;;  %v650_v18 = vmul.f32 %v981_v30, %v596_v51  ;;  %vm656_vm15 = vweird.f32 %v981_v30 }
 0x114   : > { %722 = vst [vmem:[%s1400_s29 + $0x18] sm:$0xff] %v714_v12  ;;  %982 = vrsqrt.f32 %v597_v13  ;;  %v566_v5 = vmul.f32 0.03125, %v549_v16  ;;  %vm657_vm1 = vmor %vm655_vm0, %vm656_vm15  ;;  %vm665_vm3 = vweird.f32 %v597_v13 }
 0x115   : > { %v648_v60 = vsel %vm647_vm14, %v979_v48, %v644_v17  ;;  %v651_v22 = vmul.f32 %v981_v30, %v650_v18 }
 0x116   : > { %v691_v23 = vmul.f32 %v683_v19, %v648_v60  ;;  %v582_v25 = vsub.f32 %v566_v5, %v574_v21 }
 0x117   : > { %v652_v26 = vmul.f32 0.5, %v651_v22 }
 0x118   : > { %v703_v27 = vmul.f32 %v1379_v43, %v691_v23  ;;  %v590_v24 = vmax.f32 %v582_v25, 0.0 }
 0x119   : > { %v653_v31 = vsub.f32 1.5, %v652_v26 }
 0x11a   : > { %v983_v32 = vpop.eup %982  ;;  %v715_v52 = vadd.f32 %v1387_v50, %v703_v27  ;;  %v598_v54 = vadd.f32 1e-06, %v590_v24 }
 0x11b   : > { %v654_v33 = vmul.f32 %v981_v30, %v653_v31  ;;  %v660_v34 = vmul.f32 %v983_v32, %v597_v13  ;;  %vm666_vm2 = vweird.f32 %v983_v32 }
 0x11c   : > { %723 = vst [vmem:[%s1400_s29 + $0x20] sm:$0xff] %v715_v52  ;;  %984 = vrsqrt.f32 %v598_v54  ;;  %vm667_vm4 = vmor %vm665_vm3, %vm666_vm2  ;;  %vm675_vm6 = vweird.f32 %v598_v54 }
 0x11d   : > { %v658_v37 = vsel %vm657_vm1, %v981_v30, %v654_v33  ;;  %v661_v38 = vmul.f32 %v983_v32, %v660_v34 }
 0x11e   : > { %v692_v39 = vmul.f32 %v684_v36, %v658_v37 }
 0x11f   : > { %v662_v40 = vmul.f32 0.5, %v661_v38 }
 0x120   : > { %v704_v41 = vmul.f32 %v1379_v43, %v692_v39 }
 0x121   : > { %v663_v42 = vsub.f32 1.5, %v662_v40 }
 0x122   : > { %v985_v44 = vpop.eup %984  ;;  %v716_v45 = vadd.f32 %v1387_v50, %v704_v41 }
 0x123   : > { %v664_v28 = vmul.f32 %v983_v32, %v663_v42  ;;  %v670_v9 = vmul.f32 %v985_v44, %v598_v54  ;;  %vm676_vm5 = vweird.f32 %v985_v44 }
 0x124   : > { %724 = vst [vmem:[%s1400_s29 + $0x28] sm:$0xff] %v716_v45  ;;  %vm677_vm7 = vmor %vm675_vm6, %vm676_vm5 }
 0x125   : > { %v668_v20 = vsel %vm667_vm4, %v983_v32, %v664_v28  ;;  %v671_v46 = vmul.f32 %v985_v44, %v670_v9 }
 0x126   : > { %v693_v48 = vmul.f32 %v685_v53, %v668_v20 }
 0x127   : > { %v672_v49 = vmul.f32 0.5, %v671_v46 }
 0x128   : > { %v705_v51 = vmul.f32 %v1379_v43, %v693_v48 }
 0x129   : > { %v673_v4 = vsub.f32 1.5, %v672_v49 }
 0x12a   : > { %v717_v47 = vadd.f32 %v1387_v50, %v705_v51 }
 0x12b   : > { %v674_v55 = vmul.f32 %v985_v44, %v673_v4 }
 0x12c   : > { %725 = vst [vmem:[%s1400_s29 + $0x30] sm:$0xff] %v717_v47 }
 0x12d   : > { %v678_v35 = vsel %vm677_vm7, %v985_v44, %v674_v55 }
 0x12e   : > { %v694_v56 = vmul.f32 %v686_v14, %v678_v35 }
 0x130   : > { %v706_v57 = vmul.f32 %v1379_v43, %v694_v56 }
 0x132   : > { %v718_v58 = vadd.f32 %v1387_v50, %v706_v57 }
 0x134   : > { %726 = vst [vmem:[%s1400_s29 + $0x38] sm:$0xff] %v718_v58 }
 0x135   : > { %1103 = shalt.err (!%p1100_p8)
}
 0x136   : > { %s1154_s7 = smov 128   ;;  %s1155_s9 = smov 8  }
 0x137   : > { %905 = dma.vmem_to_hbm [thread:$0]  (%p1233_p11), %s741_s19, 1024, %s743_s13, %s728_s11, %s1154_s7, %s1154_s7, %s1155_s9  }
 0x138 PF: > { %s757_s10 = sand.u32 1, %s1134_s15   ;;  %p1511_p9 = scmp.ge.s32.totalorder %s1146_s18, 2 }
 0x139   : > { %s758_s1 = scalar_lea.sflag [#allocation4], %s757_s10 }
 0x13a   : > { %p919_p10 = pnand %p1511_p9, %p1237_p12 }
 0x13c   : > { %p920_p1 = pneg %p919_p10 }
 0x13e   : > { %1129 = dma.done.wait (%p920_p1), %s758_s1, 1024  }
 0x13f   : > { %1131 = vsyncadd (%p920_p1), %s758_s1, 4294966272  ;;  %p18_p2 = scmp.ge.s32.totalorder %s1206_s21, 4   ;;  %s1512_s15 = smov %s1138_s16 }
 0x140   : > { %s1513_s16 = smov %s1142_s17  ;;  %s1514_s17 = smov %s1218_s24 }
 0x141   : > { %s1515_s18 = smov %s1206_s21  ;;  %20 = sbr.rel (!%p18_p2) target bundleno = 9 (0x9), region = 89 }
 0x146   :  { %764 = vsyncpa [#allocation3], 1 }
 0x147   :  { %766 = vsyncpa [#allocation3 + $0x1], 1 }
 0x148   :  { %767 = vsyncpa [#allocation6], 1 }
 0x149   :  { %768 = vsyncpa [#allocation4], 1 }
 0x14a   :  { %770 = vsyncpa [#allocation4 + $0x1], 1 }

</bundles_post_ra>
